<compile_context>
chip_gen: v7x
topology: tpu7x:2x2x1
jax: 0.10.0
libtpu: 0.0.40
codegen_flags: <defaults>
</compile_context>

<pallas_src>
import functools

import jax
import jax.numpy as jnp
from jax import lax
from jax.experimental import pallas as pl
from jax.experimental.pallas import tpu as pltpu


def _cam_attn_kernel(x_ref, attn_ref, energy_acc):
    """Accumulate E = X @ X^T over N-tiles; softmax on the last tile.

    x_ref:      (bt, C, tn)  input tile, native dtype
    attn_ref:   (bt, C, C)   float32 attention output (written on last tile)
    energy_acc: (bt, C, C)   float32 VMEM scratch (Gram accumulator)
    """
    nt = pl.program_id(1)

    @pl.when(nt == 0)
    def _init():
        energy_acc[...] = jnp.zeros_like(energy_acc)

    x = x_ref[...]
    # Batched Gram over the lane (spatial) axis; no transpose materialized,
    # native-dtype MXU inputs, f32 accumulation.
    energy_acc[...] += lax.dot_general(
        x, x,
        dimension_numbers=(((2,), (2,)), ((0,), (0,))),
        preferred_element_type=jnp.float32,
    )

    @pl.when(nt == pl.num_programs(1) - 1)
    def _finalize():
        energy = energy_acc[...]
        # softmax(rowmax(E) - E) == exp(rowmin(E) - E) / sum(...)
        # -> a single cross-lane reduction instead of two (XLU is scarce).
        e_min = jnp.min(energy, axis=-1, keepdims=True)
        p = jnp.exp(e_min - energy)
        denom = jnp.sum(p, axis=-1, keepdims=True)
        attn_ref[...] = p * pl.reciprocal(denom, approx=True)


def _cam_out_kernel(gamma_ref, attn_ref, x_ref, o_ref):
    """out_tile = gamma * (A @ X_tile) + X_tile (fused, single store).

    gamma_ref: (1,) float32 in SMEM
    attn_ref:  (bt, C, C) float32
    x_ref:     (bt, C, tn) native dtype
    o_ref:     (bt, C, tn) native dtype
    """
    x = x_ref[...]
    attn = attn_ref[...].astype(x.dtype)  # bf16 MXU path when x is bf16
    out = lax.dot_general(
        attn, x,
        dimension_numbers=(((2,), (1,)), ((0,), (0,))),
        preferred_element_type=jnp.float32,
    )
    o_ref[...] = (gamma_ref[0] * out + x).astype(o_ref.dtype)


def _pick_batch_tile(B, C):
    # Fold several batch elements per grid step when C is small, so the MXU
    # and the ~0.35us per-grid-step overhead are better amortized.
    cap = max(1, 256 // max(C, 1)) if C < 128 else 1
    bt = 1
    for d in range(1, B + 1):
        if B % d == 0 and d <= cap:
            bt = d
    return bt


def _pick_n_tile(N, C, bt, itemsize, max_tile_bytes=2 * 1024 * 1024):
    # Largest multiple-of-128 divisor of N whose (bt, C, tn) tile stays small.
    if N % 128 != 0:
        return N  # full axis; block == array dim satisfies the layout rule
    tn = 128
    while (N % (tn * 2) == 0
           and bt * C * (tn * 2) * itemsize <= max_tile_bytes):
        tn *= 2
    return tn


def _vmem_limit(need_bytes):
    # Explicit scoped-VMEM budget: 2x headroom for internal scratch, clamped
    # to [32 MiB, 64 MiB] so it is valid on v5e/v6e/v7x alike.
    return int(min(64 * 1024 * 1024, max(32 * 1024 * 1024, 2 * need_bytes)))


@functools.partial(jax.jit, static_argnames=("batch_tile", "n_tile"))
def cam_module(x, gamma, *, batch_tile=None, n_tile=None):
    """Channel attention forward.  x: (B, C, H, W) NCHW, gamma: (1,)."""
    B, C, H, W = x.shape
    N = H * W
    x_flat = x.reshape(B, C, N)
    itemsize = x.dtype.itemsize

    bt = batch_tile if batch_tile is not None else _pick_batch_tile(B, C)
    assert B % bt == 0, "batch_tile must divide B"
    tn = n_tile if n_tile is not None else _pick_n_tile(N, C, bt, itemsize)
    assert N % tn == 0, "n_tile must divide H*W"
    assert tn == N or tn % 128 == 0, "n_tile must be a multiple of 128 or H*W"

    grid = (B // bt, N // tn)
    attn_bytes = bt * C * C * 4
    x_tile_bytes = bt * C * tn * itemsize

    # ---- pass 1: attention = softmax(rowmax(E) - E),  E = X @ X^T --------
    attention = pl.pallas_call(
        _cam_attn_kernel,
        out_shape=jax.ShapeDtypeStruct((B, C, C), jnp.float32),
        grid_spec=pltpu.PrefetchScalarGridSpec(
            num_scalar_prefetch=0,
            grid=grid,
            in_specs=[
                pl.BlockSpec((bt, C, tn), lambda b, n: (b, 0, n)),
            ],
            out_specs=pl.BlockSpec((bt, C, C), lambda b, n: (b, 0, 0)),
            scratch_shapes=[pltpu.VMEM((bt, C, C), jnp.float32)],
        ),
        compiler_params=pltpu.CompilerParams(
            dimension_semantics=("parallel", "arbitrary"),
            vmem_limit_bytes=_vmem_limit(2 * x_tile_bytes + 3 * attn_bytes),
        ),
    )(x_flat)

    # ---- pass 2: out = gamma * (attention @ X) + X ------------------------
    out_flat = pl.pallas_call(
        _cam_out_kernel,
        out_shape=jax.ShapeDtypeStruct((B, C, N), x.dtype),
        grid_spec=pltpu.PrefetchScalarGridSpec(
            num_scalar_prefetch=0,
            grid=grid,
            in_specs=[
                pl.BlockSpec(memory_space=pltpu.SMEM),              # gamma
                pl.BlockSpec((bt, C, C), lambda b, n: (b, 0, 0)),   # attention
                pl.BlockSpec((bt, C, tn), lambda b, n: (b, 0, n)),  # x tile
            ],
            out_specs=pl.BlockSpec((bt, C, tn), lambda b, n: (b, 0, n)),
        ),
        compiler_params=pltpu.CompilerParams(
            dimension_semantics=("parallel", "parallel"),
            vmem_limit_bytes=_vmem_limit(2 * attn_bytes + 4 * x_tile_bytes),
        ),
    )(gamma, attention, x_flat)

    return out_flat.reshape(B, C, H, W)


if __name__ == "__main__":
    key = jax.random.PRNGKey(0)
    gamma = jnp.ones((1,), dtype=jnp.float32)  # Parameter(torch.ones(1))

    def reference(x, gamma):
        B, C, H, W = x.shape
        xf = x.reshape(B, C, H * W).astype(jnp.float32)
        energy = jnp.einsum("bcn,bdn->bcd", xf, xf)
        energy_new = jnp.max(energy, axis=-1, keepdims=True) - energy
        attn = jax.nn.softmax(energy_new, axis=-1)
        out = jnp.einsum("bcd,bdn->bcn", attn, xf).reshape(B, C, H, W)
        return gamma[0] * out + x.astype(jnp.float32)

    cases = [
        # (shape, kwargs).  Second case forces the N-tiled Gram accumulation
        # path; third case exercises a spatial size not a multiple of 128.
        ((2, 4, 16, 16), {}),
        ((2, 4, 16, 16), {"batch_tile": 1, "n_tile": 128}),
        ((3, 8, 12, 12), {}),
    ]
    for shape, kwargs in cases:
        key, sub = jax.random.split(key)
        x = jax.random.normal(sub, shape, dtype=jnp.float32)
        out = cam_module(x, gamma, **kwargs)
        jax.block_until_ready(out)
        ref = reference(x, gamma)
        assert out.shape == x.shape
        # Tolerance widened vs. exact f32: approx reciprocal + tiled
        # accumulation order differ slightly from the XLA reference.
        assert jnp.allclose(out, ref.astype(out.dtype), atol=1e-2, rtol=1e-2), (
            f"mismatch vs reference for shape={shape}, kwargs={kwargs}")

    print("KERNEL_OK")
</pallas_src>

<mosaic_0001>
module attributes {stable_mosaic.version = 11 : i64} {
  func.func @_cam_out_kernel(%arg0: i32, %arg1: i32, %arg2: memref<1xf32, #tpu.memory_space<smem>>, %arg3: memref<2x4x4xf32, #tpu.memory_space<vmem>>, %arg4: memref<2x4x256xf32, #tpu.memory_space<vmem>>, %arg5: memref<2x4x256xf32, #tpu.memory_space<vmem>>) attributes {dimension_semantics = [#tpu.dimension_semantics<parallel>, #tpu.dimension_semantics<parallel>], iteration_bounds = array<i64: 1, 1>, scalar_prefetch = 0 : i64, scratch_operands = 0 : i64, tpu.core_type = #tpu.core_type<tc>, window_params = [{transform_indices = @transform_0, window_bounds = array<i64: 1>}, {transform_indices = @transform_1, window_bounds = array<i64: 2, 4, 4>}, {transform_indices = @transform_2, window_bounds = array<i64: 2, 4, 256>}, {transform_indices = @transform_3, window_bounds = array<i64: 2, 4, 256>}]} {
    %c0 = arith.constant 0 : index
    %c0_0 = arith.constant 0 : index
    %c0_1 = arith.constant 0 : index
    %0 = vector.load %arg4[%c0, %c0_0, %c0_1] : memref<2x4x256xf32, #tpu.memory_space<vmem>>, vector<2x4x256xf32>
    %c0_2 = arith.constant 0 : index
    %c0_3 = arith.constant 0 : index
    %c0_4 = arith.constant 0 : index
    %1 = vector.load %arg3[%c0_2, %c0_3, %c0_4] : memref<2x4x4xf32, #tpu.memory_space<vmem>>, vector<2x4x4xf32>
    %cst = arith.constant dense<0.000000e+00> : vector<2x4x256xf32>
    %2 = tpu.matmul %1, %0, %cst {dimension_numbers = #tpu.dot_dimension_numbers<[2], [1], [1], [2], [0, 0, 0, 1, 1, 2], [0], [0]>} : vector<2x4x4xf32>, vector<2x4x256xf32>, vector<2x4x256xf32> -> vector<2x4x256xf32>
    %c0_5 = arith.constant 0 : index
    %3 = memref.load %arg2[%c0_5] : memref<1xf32, #tpu.memory_space<smem>>
    %4 = vector.broadcast %3 : f32 to vector<2x4x256xf32>
    %5 = arith.mulf %4, %2 : vector<2x4x256xf32>
    %6 = arith.addf %5, %0 : vector<2x4x256xf32>
    %c0_6 = arith.constant 0 : index
    %c0_7 = arith.constant 0 : index
    %c0_8 = arith.constant 0 : index
    %7 = vector.load %arg5[%c0_6, %c0_7, %c0_8] : memref<2x4x256xf32, #tpu.memory_space<vmem>>, vector<2x4x256xf32>
    tpu.vector_store %arg5[%c0_6, %c0_7, %c0_8], %6 {strides = array<i32>} : memref<2x4x256xf32, #tpu.memory_space<vmem>>, vector<2x4x256xf32>,
    return
  }
  func.func @transform_0(%arg0: i32, %arg1: i32) -> i32 {
    %c0_i32 = arith.constant 0 : i32
    %c0_i32_0 = arith.constant 0 : i32
    return %c0_i32 : i32
  }
  func.func @transform_1(%arg0: i32, %arg1: i32) -> (i32, i32, i32) {
    %c0_i32 = arith.constant 0 : i32
    %c0_i32_0 = arith.constant 0 : i32
    %c0_i32_1 = arith.constant 0 : i32
    return %arg0, %c0_i32, %c0_i32_0 : i32, i32, i32
  }
  func.func @transform_2(%arg0: i32, %arg1: i32) -> (i32, i32, i32) {
    %c0_i32 = arith.constant 0 : i32
    %c0_i32_0 = arith.constant 0 : i32
    return %arg0, %c0_i32, %arg1 : i32, i32, i32
  }
  func.func @transform_3(%arg0: i32, %arg1: i32) -> (i32, i32, i32) {
    %c0_i32 = arith.constant 0 : i32
    %c0_i32_0 = arith.constant 0 : i32
    return %arg0, %c0_i32, %arg1 : i32, i32, i32
  }
}

module attributes {stable_mosaic.version = 11 : i64} {
  func.func @_cam_attn_kernel(%arg0: i32, %arg1: i32, %arg2: memref<2x4x256xf32, #tpu.memory_space<vmem>>, %arg3: memref<2x4x4xf32, #tpu.memory_space<vmem>>, %arg4: memref<2x4x4xf32, #tpu.memory_space<vmem>>) attributes {dimension_semantics = [#tpu.dimension_semantics<parallel>, #tpu.dimension_semantics<arbitrary>], iteration_bounds = array<i64: 1, 1>, scalar_prefetch = 0 : i64, scratch_operands = 1 : i64, tpu.core_type = #tpu.core_type<tc>, window_params = [{transform_indices = @transform_0, window_bounds = array<i64: 2, 4, 256>}, {transform_indices = @transform_1, window_bounds = array<i64: 2, 4, 4>}]} {
    %c0_i32 = arith.constant 0 : i32
    %0 = arith.cmpi eq, %arg1, %c0_i32 : i32
    %1 = arith.extui %0 : i1 to i32
    %c0_i32_0 = arith.constant 0 : i32
    %2 = arith.cmpi ne, %1, %c0_i32_0 : i32
    scf.if %2 {
      %cst_11 = arith.constant 0.000000e+00 : f32
      %11 = vector.broadcast %cst_11 : f32 to vector<2x4x4xf32>
      %c0_12 = arith.constant 0 : index
      %c0_13 = arith.constant 0 : index
      %c0_14 = arith.constant 0 : index
      %12 = vector.load %arg4[%c0_12, %c0_13, %c0_14] : memref<2x4x4xf32, #tpu.memory_space<vmem>>, vector<2x4x4xf32>
      tpu.vector_store %arg4[%c0_12, %c0_13, %c0_14], %11 {strides = array<i32>} : memref<2x4x4xf32, #tpu.memory_space<vmem>>, vector<2x4x4xf32>,
    } else {
    }
    %c0 = arith.constant 0 : index
    %c0_1 = arith.constant 0 : index
    %c0_2 = arith.constant 0 : index
    %3 = vector.load %arg2[%c0, %c0_1, %c0_2] : memref<2x4x256xf32, #tpu.memory_space<vmem>>, vector<2x4x256xf32>
    %c0_3 = arith.constant 0 : index
    %c0_4 = arith.constant 0 : index
    %c0_5 = arith.constant 0 : index
    %4 = vector.load %arg4[%c0_3, %c0_4, %c0_5] : memref<2x4x4xf32, #tpu.memory_space<vmem>>, vector<2x4x4xf32>
    %cst = arith.constant dense<0.000000e+00> : vector<2x4x4xf32>
    %5 = tpu.matmul %3, %3, %cst {dimension_numbers = #tpu.dot_dimension_numbers<[2], [2], [1], [1], [0, 0, 0, 1, 1, 1], [0], [0]>} : vector<2x4x256xf32>, vector<2x4x256xf32>, vector<2x4x4xf32> -> vector<2x4x4xf32>
    %6 = arith.addf %4, %5 : vector<2x4x4xf32>
    %c0_6 = arith.constant 0 : index
    %c0_7 = arith.constant 0 : index
    %c0_8 = arith.constant 0 : index
    %7 = vector.load %arg4[%c0_6, %c0_7, %c0_8] : memref<2x4x4xf32, #tpu.memory_space<vmem>>, vector<2x4x4xf32>
    tpu.vector_store %arg4[%c0_6, %c0_7, %c0_8], %6 {strides = array<i32>} : memref<2x4x4xf32, #tpu.memory_space<vmem>>, vector<2x4x4xf32>,
    %c0_i32_9 = arith.constant 0 : i32
    %8 = arith.cmpi eq, %arg1, %c0_i32_9 : i32
    %9 = arith.extui %8 : i1 to i32
    %c0_i32_10 = arith.constant 0 : i32
    %10 = arith.cmpi ne, %9, %c0_i32_10 : i32
    scf.if %10 {
      %c0_11 = arith.constant 0 : index
      %c0_12 = arith.constant 0 : index
      %c0_13 = arith.constant 0 : index
      %11 = vector.load %arg4[%c0_11, %c0_12, %c0_13] : memref<2x4x4xf32, #tpu.memory_space<vmem>>, vector<2x4x4xf32>
      %cst_14 = arith.constant dense<0x7F800000> : vector<2x4xf32>
      %12 = vector.multi_reduction <minimumf>, %11, %cst_14 [2] : vector<2x4x4xf32> to vector<2x4xf32>
      %13 = vector.shape_cast %12 : vector<2x4xf32> to vector<2x4x1xf32>
      %14 = vector.broadcast %13 : vector<2x4x1xf32> to vector<2x4x4xf32>
      %15 = arith.subf %14, %11 : vector<2x4x4xf32>
      %16 = math.exp %15 : vector<2x4x4xf32>
      %cst_15 = arith.constant dense<0.000000e+00> : vector<2x4xf32>
      %17 = vector.multi_reduction <add>, %16, %cst_15 [2] : vector<2x4x4xf32> to vector<2x4xf32>
      %18 = vector.shape_cast %17 : vector<2x4xf32> to vector<2x4x1xf32>
      %19 = tpu.reciprocal %18 {approx = true} : vector<2x4x1xf32> -> vector<2x4x1xf32>
      %20 = vector.broadcast %19 : vector<2x4x1xf32> to vector<2x4x4xf32>
      %21 = arith.mulf %16, %20 : vector<2x4x4xf32>
      %c0_16 = arith.constant 0 : index
      %c0_17 = arith.constant 0 : index
      %c0_18 = arith.constant 0 : index
      %22 = vector.load %arg3[%c0_16, %c0_17, %c0_18] : memref<2x4x4xf32, #tpu.memory_space<vmem>>, vector<2x4x4xf32>
      tpu.vector_store %arg3[%c0_16, %c0_17, %c0_18], %21 {strides = array<i32>} : memref<2x4x4xf32, #tpu.memory_space<vmem>>, vector<2x4x4xf32>,
    } else {
    }
    return
  }
  func.func @transform_0(%arg0: i32, %arg1: i32) -> (i32, i32, i32) {
    %c0_i32 = arith.constant 0 : i32
    %c0_i32_0 = arith.constant 0 : i32
    return %arg0, %c0_i32, %arg1 : i32, i32, i32
  }
  func.func @transform_1(%arg0: i32, %arg1: i32) -> (i32, i32, i32) {
    %c0_i32 = arith.constant 0 : i32
    %c0_i32_0 = arith.constant 0 : i32
    %c0_i32_1 = arith.constant 0 : i32
    return %arg0, %c0_i32, %c0_i32_0 : i32, i32, i32
  }
}

</mosaic_0001>

<bundles_post_ra>
// kernel: cam_module.3
= control target key start
LH: loop header
LB: loop body
LE: loop exit
PB: predicated region body
PF: predicated region fallthrough
CT: control target
= control target key end

     0   :  { %vm25_vm0 = vcmask 1043456   ;;  %v216_v2 = vmov 0.0   ;;  %vm21_vm1 = vcmask 31744   ;;  %s258_s2 = inlined_call_operand.vmem [shape: f32[2,4,256], index: 2, kind: input, shape index: {}]   ;;  %s259_s1 = inlined_call_operand.vmem [shape: f32[2,4,4], index: 1, kind: input, shape index: {}]   ;;  %s260_s0 = inlined_call_operand.<no memory space> [shape: f32[1], index: 0, kind: input, shape index: {}]   ;;  %s261_s3 = inlined_call_operand.vmem [shape: f32[2,4,256], index: 3, kind: output, shape index: {}]  }
   0x1   :  { %v15_v0 = vld [vmem:[%s258_s2] sm:$0xff]  ;;  %v16_v1 = vld [vmem:[%s258_s2 + $0x8] sm:$0xff]  ;;  %94 = vmatprep.mubr.f32.mxu0 %v216_v2  ;;  %174 = vmatprep.mubr.f32.mxu1 %v216_v2  ;;  %v182_v7 = vstv %s260_s0 }
   0x2   :  { %v20_v3 = vcombine.high %v15_v0, %v15_v0  ;;  %v102_v4 = vcombine.high %v16_v1, %v16_v1  ;;  %v17_v5 = vld [vmem:[%s259_s1] sm:$0xf]  ;;  %v18_v6 = vld [vmem:[%s259_s1 + $0x4] sm:$0xf] }
   0x4   :  { %207 = vmatprep.subr.msk.mxu0 %vm25_vm0, %v20_v3  ;;  %210 = vmatprep.subr.msk.mxu1 %vm25_vm0, %v102_v4 }
   0x5   :  { %208 = vmatpush1.msk.msra.mxu0 %vm25_vm0, %v15_v0  ;;  %211 = vmatpush1.msk.msra.mxu1 %vm25_vm0, %v16_v1 }
   0x6   :  { %209 = vmatmul.mubr.msk.f32.vlgmr.msra.gmra.mrb[0].mxu0 %vm21_vm1, %v17_v5  ;;  %212 = vmatmul.mubr.msk.f32.vlgmr.msra.gmra.mrb[0].mxu1 %vm21_vm1, %v18_v6 }
  0xd9   :  { %v96_v8 = vpop.f32.mrb[0].mxu0  ;;  %v176_v9 = vpop.f32.mrb[0].mxu1 }
  0xda   :  { %v183_v10 = vmul.f32 %v182_v7, %v96_v8  ;;  %v185_v11 = vmul.f32 %v182_v7, %v176_v9  ;;  %v98_v12 = vpop.f32.mrb[1].mxu0  ;;  %v178_v13 = vpop.f32.mrb[1].mxu1 }
  0xdb   :  { %v184_v14 = vmul.f32 %v182_v7, %v98_v12  ;;  %v186_v15 = vmul.f32 %v182_v7, %v178_v13 }
  0xdc   :  { %v189_v16 = vadd.f32 %v183_v10, %v15_v0  ;;  %v191_v17 = vadd.f32 %v185_v11, %v16_v1 }
  0xdd   :  { %v190_v18 = vadd.f32 %v184_v14, %v20_v3  ;;  %v192_v19 = vadd.f32 %v186_v15, %v102_v4 }
  0xdf   :  { %v197_v20 = vcombine.low %v189_v16, %v190_v18  ;;  %v198_v21 = vcombine.low %v191_v17, %v192_v19 }
  0xe1   :  { %201 = vst [vmem:[%s261_s3] sm:$0xff] %v197_v20  ;;  %202 = vst [vmem:[%s261_s3 + $0x8] sm:$0xff] %v198_v21 }

// kernel: cam_module.2
= control target key start
LH: loop header
LB: loop body
LE: loop exit
PB: predicated region body
PF: predicated region fallthrough
CT: control target
= control target key end

     0   :  { %vm12_vm0 = vcmask 27648   ;;  %v214_v2 = vmov 0.0   ;;  %s247_s0 = inlined_call_operand.vmem [shape: f32[2,4,256], index: 0, kind: input, shape index: {}]   ;;  %s248_s1 = inlined_call_operand.vmem [shape: f32[2,4,4], index: 1, kind: output, shape index: {}]  }
   0x1   :  { %v15_v0 = vld [vmem:[%s247_s0] sm:$0xff]  ;;  %v16_v1 = vld [vmem:[%s247_s0 + $0x8] sm:$0xff]  ;;  %13 = vst.msk [vmem:[#allocation2] sm:$0xf] %vm12_vm0, %v214_v2  ;;  %14 = vst.msk [vmem:[#allocation2 + $0x4] sm:$0xf] %vm12_vm0, %v214_v2 }
   0x2   :  { %v20_v3 = vcombine.high %v15_v0, %v15_v0  ;;  %v93_v4 = vcombine.high %v16_v1, %v16_v1 }
   0x4   :  { %22 = vmatprep.subr.mxu0 %v20_v3  ;;  %86 = vmatprep.mubr.f32.mxu0 %v20_v3 }
   0x5   :  { %23 = vmatpush1.xpose.msra.mxu0 %v15_v0  ;;  %95 = vmatprep.subr.mxu1 %v93_v4 }
   0x6   :  { %96 = vmatpush1.xpose.msra.mxu1 %v16_v1  ;;  %159 = vmatprep.mubr.f32.mxu1 %v93_v4 }
   0x8   :  { %87 = vmatmul.mubr.f32.vlgmr.msra.gmra.mrb[0].mxu0 %v15_v0  ;;  %v17_v5 = vld [vmem:[#allocation2] sm:$0xf]  ;;  %v18_v6 = vld [vmem:[#allocation2 + $0x4] sm:$0xf] }
   0x9   :  { %160 = vmatmul.mubr.f32.vlgmr.msra.gmra.mrb[0].mxu1 %v16_v1 }
  0xdb   :  { %v88_v7 = vpop.f32.mrb[0].mxu0 }
  0xdc   :  { %v165_v8 = vadd.f32 %v88_v7, %v17_v5  ;;  %v90_v9 = vpop.f32.mrb[1].mxu0  ;;  %v161_v10 = vpop.f32.mrb[0].mxu1 }
  0xdd   :  { %v166_v11 = vadd.f32 %v161_v10, %v18_v6  ;;  %v163_v12 = vpop.f32.mrb[1].mxu1 }
  0xde   :  { %168 = vst.msk [vmem:[#allocation2] sm:$0xf] %vm12_vm0, %v165_v8 }
  0xdf   :  { %169 = vst.msk [vmem:[#allocation2 + $0x4] sm:$0xf] %vm12_vm0, %v166_v11 }
  0xe5   :  { %v173_v13 = vld [vmem:[#allocation2] sm:$0xf] }
  0xe6   :  { %v175_v14 = vsel %vm12_vm0, %v173_v13, inf  ;;  %v174_v15 = vld [vmem:[#allocation2 + $0x4] sm:$0xf] }
  0xe7   :  { %176 = vmin.xlane.f32.xlu0 %v175_v14  ;;  %v178_v16 = vsel %vm12_vm0, %v174_v15, inf }
  0xeb   :  { %179 = vmin.xlane.f32.xlu0 %v178_v16 }
 0x174   :  { %v177_v17 = vpop.xlane.xlu0 %176 }
 0x175   :  { %v181_v18 = vsub.f32 %v177_v17, %v173_v13 }
 0x177   :  { %v183_v19 = vmul.f32 1.442695, %v181_v18 }
 0x178   :  { %v180_v20 = vpop.xlane.xlu0 %179 }
 0x179   :  { %206 = vpow2.f32 %v183_v19  ;;  %v182_v21 = vsub.f32 %v180_v20, %v174_v15 }
 0x17b   :  { %v185_v22 = vmul.f32 1.442695, %v182_v21 }
 0x17d   :  { %208 = vpow2.f32 %v185_v22 }
 0x183   :  { %v207_v23 = vpop.eup %206 }
 0x184   :  { %v187_v24 = vsel %vm12_vm0, %v207_v23, 0.0 }
 0x185   :  { %188 = vadd.xlane.f32.xlu1 %v187_v24 }
 0x187   :  { %v209_v25 = vpop.eup %208 }
 0x188   :  { %v190_v26 = vsel %vm12_vm0, %v209_v25, 0.0 }
 0x189   :  { %191 = vadd.xlane.f32.xlu1 %v190_v26 }
 0x212   :  { %v189_v27 = vpop.xlane.xlu1 %188 }
 0x213   :  { %210 = vrcp.f32 %v189_v27 }
 0x216   :  { %v192_v28 = vpop.xlane.xlu1 %191 }
 0x217   :  { %212 = vrcp.f32 %v192_v28 }
 0x21d   :  { %v211_v29 = vpop.eup %210 }
 0x21e   :  { %v195_v30 = vmul.f32 %v211_v29, %v207_v23 }
 0x220   :  { %197 = vst.msk [vmem:[%s248_s1] sm:$0xf] %vm12_vm0, %v195_v30 }
 0x221   :  { %v213_v31 = vpop.eup %212 }
 0x222   :  { %v196_v32 = vmul.f32 %v213_v31, %v209_v25 }
 0x224   :  { %198 = vst.msk [vmem:[%s248_s1 + $0x4] sm:$0xf] %vm12_vm0, %v196_v32 }

</bundles_post_ra>
